<compile_context>
chip_gen: v7x
topology: tpu7x:2x2x1
jax: 0.10.0
libtpu: 0.0.40
codegen_flags: <defaults>
</compile_context>

<pallas_src>
import functools

import jax
import jax.numpy as jnp
from jax import lax
from jax.experimental import pallas as pl
from jax.experimental.pallas import tpu as pltpu

_LANES = 128
_EPS = 1e-5


def _round_up(x, m):
    return (x + m - 1) // m * m


def _choose_tile_h(H, W, Cin, Cout, Wq, itemsize, vmem_budget=6 << 20):
    """Largest H-tile that divides H, is a multiple of 8 sublanes, keeps the
    conv-output block lane-dense and fits a modest VMEM budget (so the 2-deep
    pipeline also fits v7x's 64 MiB physical VMEM)."""
    best = None
    for th in range(8, H + 1, 8):
        if H % th:
            continue
        if (th * W) % _LANES != 0 and th != H:
            continue
        tile_bytes = itemsize * (
            2 * Cin * th * Wq        # body input block, double buffered
            + 2 * Cin * 8 * Wq       # halo input block, double buffered
            + 2 * Cout * th * W      # conv output block, double buffered
            + Cin * (th + 8) * Wq    # row-assembly scratch
        ) + 4 * Cout * th * Wq       # f32 accumulator
        if tile_bytes > vmem_budget:
            break
        best = th
    return best if best is not None else H


def _make_conv_stats_kernel(Cin, Cout, KH, KW, TH, W, Wq):
    TWq = TH * Wq

    def kernel(xb_ref, xh_ref, w_ref, y_ref, stats_ref, xrow_ref):
        # xb_ref : (1, Cin, TH*Wq)   padded rows [i*TH, (i+1)*TH), flattened
        # xh_ref : (1, Cin, 8*Wq)    next 8 padded rows (halo; 2 are used)
        # w_ref  : (KH, Cout, KW*Cin)
        # y_ref  : (1, Cout, TH*W)   conv output tile (NCHW, flattened H*W)
        # stats  : (1, 1, Cout, 2)   per-tile (sum, sum_sq) per channel
        # xrow   : (Cin, (TH+8)*Wq)  scratch: contiguous padded rows of this tile
        xrow_ref[:, :TWq] = xb_ref[0]
        xrow_ref[:, TWq:] = xh_ref[0]

        acc = jnp.zeros((Cout, TWq), jnp.float32)
        for kh in range(KH):                                  # static unroll
            base = kh * Wq
            # fold the kw taps into the contraction: K = KW*Cin
            rhs = jnp.concatenate(
                [xrow_ref[:, base + kw: base + kw + TWq] for kw in range(KW)],
                axis=0)                                       # (KW*Cin, TH*Wq)
            acc = acc + jnp.dot(w_ref[kh], rhs,
                                preferred_element_type=jnp.float32)

        # keep only the W valid columns of every Wq-wide padded row
        yv = jnp.concatenate(
            [acc[:, h * Wq: h * Wq + W] for h in range(TH)], axis=1)  # (Cout, TH*W)

        y_ref[0] = yv.astype(y_ref.dtype)
        s1 = jnp.sum(yv, axis=1, keepdims=True)               # (Cout, 1)
        s2 = jnp.sum(yv * yv, axis=1, keepdims=True)          # (Cout, 1)
        stats_ref[0, 0, :, :] = jnp.concatenate([s1, s2], axis=1)

    return kernel


def _bn_relu_kernel(y_ref, scale_ref, bias_ref, o_ref):
    y = y_ref[0].astype(jnp.float32)                          # (Cout, TH*W)
    o = y * scale_ref[...] + bias_ref[...]                    # (Cout,1) lane bcast
    o_ref[0] = jnp.maximum(o, 0.0).astype(o_ref.dtype)


def conv2d_bn_relu(x_nchw, w_oihw, gamma, beta, *, padding=1, tile_h=None,
                   compute_dtype=None):
    """Conv2d(k=3, s=1, p=1, bias=False) + BatchNorm2d(batch stats) + ReLU.

    NCHW input / OIHW weights / NCHW output, matching the PyTorch module.
    compute_dtype=jnp.bfloat16 feeds the v6e/v7x MXU at bf16; accumulation and
    BN statistics always stay in float32.
    """
    N, Cin, H, W = x_nchw.shape
    Cout, Cin_w, KH, KW = w_oihw.shape
    assert Cin_w == Cin and KH == 3 and KW == 3 and padding == 1
    assert H % 8 == 0, "H tiling works in multiples of 8 sublanes"

    cdt = jnp.dtype(compute_dtype) if compute_dtype is not None else x_nchw.dtype
    itemsize = jnp.dtype(cdt).itemsize

    # --- layout prep (cheap wrapper-side ops) ------------------------------
    # width padded to a multiple of 16 so every flattened block is a multiple
    # of 128 lanes; height gets 1 top + 7 bottom zero rows so the 8-row halo
    # block of the last tile stays in range.
    Wq = _round_up(W + 2 * padding, 16)
    Hp = H + 8
    x_pad = jnp.pad(
        x_nchw.astype(cdt),
        ((0, 0), (0, 0), (padding, Hp - H - padding), (padding, Wq - W - padding)))
    x_flat = x_pad.reshape(N, Cin, Hp * Wq)

    # OIHW -> (KH, Cout, KW*Cin), contraction row index = kw*Cin + cin
    w2 = jnp.transpose(w_oihw.astype(cdt), (2, 0, 3, 1)).reshape(KH, Cout, KW * Cin)

    TH = tile_h if tile_h is not None else _choose_tile_h(H, W, Cin, Cout, Wq, itemsize)
    assert H % TH == 0 and TH % 8 == 0
    assert (TH * W) % _LANES == 0 or TH == H
    nH = H // TH
    TWq = TH * Wq

    conv_kernel = _make_conv_stats_kernel(Cin, Cout, KH, KW, TH, W, Wq)
    conv_cost = pl.CostEstimate(
        flops=2 * N * H * W * KH * KW * Cin * Cout,
        transcendentals=0,
        bytes_accessed=int(x_flat.size * itemsize + w2.size * itemsize
                           + N * Cout * H * W * x_nchw.dtype.itemsize
                           + N * nH * Cout * 2 * 4))

    y_conv, stats = pl.pallas_call(
        conv_kernel,
        out_shape=(
            jax.ShapeDtypeStruct((N, Cout, H * W), x_nchw.dtype),
            jax.ShapeDtypeStruct((N, nH, Cout, 2), jnp.float32),
        ),
        grid=(N, nH),
        in_specs=[
            # body: padded rows [i*TH, (i+1)*TH) of sample n
            pl.BlockSpec((1, Cin, TWq), lambda n, i: (n, 0, i)),
            # halo: next 8 padded rows of the same array (only 2 are used)
            pl.BlockSpec((1, Cin, 8 * Wq), lambda n, i: (n, 0, (i + 1) * (TH // 8))),
            pl.BlockSpec((KH, Cout, KW * Cin), lambda n, i: (0, 0, 0)),
        ],
        out_specs=(
            pl.BlockSpec((1, Cout, TH * W), lambda n, i: (n, 0, i)),
            pl.BlockSpec((1, 1, Cout, 2), lambda n, i: (n, i, 0, 0)),
        ),
        scratch_shapes=[pltpu.VMEM((Cin, (TH + 8) * Wq), cdt)],
        compiler_params=pltpu.CompilerParams(
            dimension_semantics=("parallel", "parallel")),
        cost_estimate=conv_cost,
    )(x_flat, x_flat, w2)

    # --- global BN batch statistics (tiny per-channel reduction) -----------
    # TODO(synk): BatchNorm running_mean/running_var momentum update is a
    # training-time buffer side effect and is not produced here.
    tot = jnp.sum(stats, axis=(0, 1))                          # (Cout, 2)
    count = float(N * H * W)
    mean = tot[:, 0] / count
    var = tot[:, 1] / count - mean * mean                      # biased batch var
    inv = lax.rsqrt(var + _EPS)
    g32 = gamma.astype(jnp.float32)
    scale = (g32 * inv).reshape(Cout, 1)
    bias = (beta.astype(jnp.float32) - mean * g32 * inv).reshape(Cout, 1)

    apply_cost = pl.CostEstimate(
        flops=3 * N * Cout * H * W, transcendentals=0,
        bytes_accessed=int(2 * N * Cout * H * W * x_nchw.dtype.itemsize))

    out_flat = pl.pallas_call(
        _bn_relu_kernel,
        out_shape=jax.ShapeDtypeStruct((N, Cout, H * W), x_nchw.dtype),
        grid=(N, nH),
        in_specs=[
            pl.BlockSpec((1, Cout, TH * W), lambda n, i: (n, 0, i)),
            pl.BlockSpec((Cout, 1), lambda n, i: (0, 0)),
            pl.BlockSpec((Cout, 1), lambda n, i: (0, 0)),
        ],
        out_specs=pl.BlockSpec((1, Cout, TH * W), lambda n, i: (n, 0, i)),
        compiler_params=pltpu.CompilerParams(
            dimension_semantics=("parallel", "parallel")),
        cost_estimate=apply_cost,
    )(y_conv, scale, bias)

    return out_flat.reshape(N, Cout, H, W)


def _reference(x_nchw, w_oihw, gamma, beta, padding=1):
    """Pure-JAX reference (lax conv + batch-stats BN + relu)."""
    y = lax.conv_general_dilated(
        x_nchw, w_oihw, window_strides=(1, 1),
        padding=[(padding, padding), (padding, padding)],
        dimension_numbers=("NCHW", "OIHW", "NCHW"))
    mean = jnp.mean(y, axis=(0, 2, 3), keepdims=True)
    var = jnp.mean((y - mean) ** 2, axis=(0, 2, 3), keepdims=True)
    yhat = (y - mean) * lax.rsqrt(var + _EPS)
    y = yhat * gamma.reshape(1, -1, 1, 1) + beta.reshape(1, -1, 1, 1)
    return jnp.maximum(y, 0.0)


if __name__ == "__main__":
    # Module config: Conv2d(in_channels=4, out_channels=8) with defaults
    # (kernel_size=3, stride=1, padding=1, relu=True, bn=True -> no conv bias).
    N, Cin, H, W = 2, 4, 16, 16
    Cout, K = 8, 3

    key = jax.random.PRNGKey(0)
    kx, kw, kg, kb = jax.random.split(key, 4)

    x = jax.random.normal(kx, (N, Cin, H, W), dtype=jnp.float32)
    fan_in, fan_out = Cin * K * K, Cout * K * K
    limit = (6.0 / (fan_in + fan_out)) ** 0.5
    w = jax.random.uniform(kw, (Cout, Cin, K, K), dtype=jnp.float32,
                           minval=-limit, maxval=limit)
    gamma = 1.0 + 0.1 * jax.random.normal(kg, (Cout,), dtype=jnp.float32)
    beta = 0.1 * jax.random.normal(kb, (Cout,), dtype=jnp.float32)

    # tile_h=8 exercises the (batch, H-tile) grid incl. the halo path.
    fwd = jax.jit(functools.partial(conv2d_bn_relu, tile_h=8))
    out = jax.block_until_ready(fwd(x, w, gamma, beta))

    ref = _reference(x, w, gamma, beta)
    assert out.shape == (N, Cout, H, W)
    err = float(jnp.abs(out - ref).max())
    assert jnp.allclose(out, ref, atol=2e-4, rtol=2e-4), err

    print("KERNEL_OK")
</pallas_src>

<mosaic_0001>
module attributes {stable_mosaic.version = 11 : i64} {
  func.func @kernel(%arg0: i32, %arg1: i32, %arg2: memref<1x4x256xf32, #tpu.memory_space<vmem>>, %arg3: memref<1x4x256xf32, #tpu.memory_space<vmem>>, %arg4: memref<3x8x12xf32, #tpu.memory_space<vmem>>, %arg5: memref<1x8x128xf32, #tpu.memory_space<vmem>>, %arg6: memref<1x1x8x2xf32, #tpu.memory_space<vmem>>, %arg7: memref<4x512xf32, #tpu.memory_space<vmem>>) attributes {dimension_semantics = [#tpu.dimension_semantics<parallel>, #tpu.dimension_semantics<parallel>], iteration_bounds = array<i64: 2, 2>, scalar_prefetch = 0 : i64, scratch_operands = 1 : i64, tpu.core_type = #tpu.core_type<tc>, window_params = [{transform_indices = @transform_0, window_bounds = array<i64: 1, 4, 256>}, {transform_indices = @transform_1, window_bounds = array<i64: 1, 4, 256>}, {pipeline_mode = #tpu.pipeline_mode<synchronous>, transform_indices = @transform_2, window_bounds = array<i64: 3, 8, 12>}, {transform_indices = @transform_3, window_bounds = array<i64: 1, 8, 128>}, {transform_indices = @transform_4, window_bounds = array<i64: 1, 1, 8, 2>}]} {
    %c0 = arith.constant 0 : index
    %c0_0 = arith.constant 0 : index
    %c0_1 = arith.constant 0 : index
    %0 = vector.load %arg2[%c0, %c0_0, %c0_1] : memref<1x4x256xf32, #tpu.memory_space<vmem>>, vector<1x4x256xf32>
    %1 = vector.shape_cast %0 : vector<1x4x256xf32> to vector<4x256xf32>
    %c0_2 = arith.constant 0 : index
    %c0_3 = arith.constant 0 : index
    %2 = vector.load %arg7[%c0_2, %c0_3] : memref<4x512xf32, #tpu.memory_space<vmem>>, vector<4x256xf32>
    tpu.vector_store %arg7[%c0_2, %c0_3], %1 {strides = array<i32>} : memref<4x512xf32, #tpu.memory_space<vmem>>, vector<4x256xf32>,
    %c0_4 = arith.constant 0 : index
    %c0_5 = arith.constant 0 : index
    %c0_6 = arith.constant 0 : index
    %3 = vector.load %arg3[%c0_4, %c0_5, %c0_6] : memref<1x4x256xf32, #tpu.memory_space<vmem>>, vector<1x4x256xf32>
    %4 = vector.shape_cast %3 : vector<1x4x256xf32> to vector<4x256xf32>
    %c0_7 = arith.constant 0 : index
    %c256 = arith.constant 256 : index
    %5 = vector.load %arg7[%c0_7, %c256] : memref<4x512xf32, #tpu.memory_space<vmem>>, vector<4x256xf32>
    tpu.vector_store %arg7[%c0_7, %c256], %4 {strides = array<i32>} : memref<4x512xf32, #tpu.memory_space<vmem>>, vector<4x256xf32>,
    %cst = arith.constant 0.000000e+00 : f32
    %6 = vector.broadcast %cst : f32 to vector<8x256xf32>
    %c0_8 = arith.constant 0 : index
    %c0_9 = arith.constant 0 : index
    %7 = vector.load %arg7[%c0_8, %c0_9] : memref<4x512xf32, #tpu.memory_space<vmem>>, vector<4x256xf32>
    %c0_10 = arith.constant 0 : index
    %c1 = arith.constant 1 : index
    %8 = vector.load %arg7[%c0_10, %c1] : memref<4x512xf32, #tpu.memory_space<vmem>>, vector<4x256xf32>
    %c0_11 = arith.constant 0 : index
    %c2 = arith.constant 2 : index
    %9 = vector.load %arg7[%c0_11, %c2] : memref<4x512xf32, #tpu.memory_space<vmem>>, vector<4x256xf32>
    %10 = tpu.concatenate %7, %8, %9 in 0 : vector<4x256xf32>, vector<4x256xf32>, vector<4x256xf32> -> vector<12x256xf32>
    %c0_12 = arith.constant 0 : index
    %c0_13 = arith.constant 0 : index
    %c0_14 = arith.constant 0 : index
    %11 = vector.load %arg4[%c0_12, %c0_13, %c0_14] : memref<3x8x12xf32, #tpu.memory_space<vmem>>, vector<1x8x12xf32>
    %12 = vector.shape_cast %11 : vector<1x8x12xf32> to vector<8x12xf32>
    %cst_15 = arith.constant dense<0.000000e+00> : vector<8x256xf32>
    %13 = tpu.matmul %12, %10, %cst_15 {dimension_numbers = #tpu.dot_dimension_numbers<[1], [0], [0], [1], [0, 0, 1, 1], [], []>} : vector<8x12xf32>, vector<12x256xf32>, vector<8x256xf32> -> vector<8x256xf32>
    %14 = arith.addf %6, %13 : vector<8x256xf32>
    %c0_16 = arith.constant 0 : index
    %c32 = arith.constant 32 : index
    %15 = vector.load %arg7[%c0_16, %c32] : memref<4x512xf32, #tpu.memory_space<vmem>>, vector<4x256xf32>
    %c0_17 = arith.constant 0 : index
    %c33 = arith.constant 33 : index
    %16 = vector.load %arg7[%c0_17, %c33] : memref<4x512xf32, #tpu.memory_space<vmem>>, vector<4x256xf32>
    %c0_18 = arith.constant 0 : index
    %c34 = arith.constant 34 : index
    %17 = vector.load %arg7[%c0_18, %c34] : memref<4x512xf32, #tpu.memory_space<vmem>>, vector<4x256xf32>
    %18 = tpu.concatenate %15, %16, %17 in 0 : vector<4x256xf32>, vector<4x256xf32>, vector<4x256xf32> -> vector<12x256xf32>
    %c1_19 = arith.constant 1 : index
    %c0_20 = arith.constant 0 : index
    %c0_21 = arith.constant 0 : index
    %19 = vector.load %arg4[%c1_19, %c0_20, %c0_21] : memref<3x8x12xf32, #tpu.memory_space<vmem>>, vector<1x8x12xf32>
    %20 = vector.shape_cast %19 : vector<1x8x12xf32> to vector<8x12xf32>
    %cst_22 = arith.constant dense<0.000000e+00> : vector<8x256xf32>
    %21 = tpu.matmul %20, %18, %cst_22 {dimension_numbers = #tpu.dot_dimension_numbers<[1], [0], [0], [1], [0, 0, 1, 1], [], []>} : vector<8x12xf32>, vector<12x256xf32>, vector<8x256xf32> -> vector<8x256xf32>
    %22 = arith.addf %14, %21 : vector<8x256xf32>
    %c0_23 = arith.constant 0 : index
    %c64 = arith.constant 64 : index
    %23 = vector.load %arg7[%c0_23, %c64] : memref<4x512xf32, #tpu.memory_space<vmem>>, vector<4x256xf32>
    %c0_24 = arith.constant 0 : index
    %c65 = arith.constant 65 : index
    %24 = vector.load %arg7[%c0_24, %c65] : memref<4x512xf32, #tpu.memory_space<vmem>>, vector<4x256xf32>
    %c0_25 = arith.constant 0 : index
    %c66 = arith.constant 66 : index
    %25 = vector.load %arg7[%c0_25, %c66] : memref<4x512xf32, #tpu.memory_space<vmem>>, vector<4x256xf32>
    %26 = tpu.concatenate %23, %24, %25 in 0 : vector<4x256xf32>, vector<4x256xf32>, vector<4x256xf32> -> vector<12x256xf32>
    %c2_26 = arith.constant 2 : index
    %c0_27 = arith.constant 0 : index
    %c0_28 = arith.constant 0 : index
    %27 = vector.load %arg4[%c2_26, %c0_27, %c0_28] : memref<3x8x12xf32, #tpu.memory_space<vmem>>, vector<1x8x12xf32>
    %28 = vector.shape_cast %27 : vector<1x8x12xf32> to vector<8x12xf32>
    %cst_29 = arith.constant dense<0.000000e+00> : vector<8x256xf32>
    %29 = tpu.matmul %28, %26, %cst_29 {dimension_numbers = #tpu.dot_dimension_numbers<[1], [0], [0], [1], [0, 0, 1, 1], [], []>} : vector<8x12xf32>, vector<12x256xf32>, vector<8x256xf32> -> vector<8x256xf32>
    %30 = arith.addf %22, %29 : vector<8x256xf32>
    %31 = vector.extract_strided_slice %30 {offsets = [0, 0], sizes = [8, 16], strides = [1, 1]} : vector<8x256xf32> to vector<8x16xf32>
    %32 = vector.extract_strided_slice %30 {offsets = [0, 32], sizes = [8, 16], strides = [1, 1]} : vector<8x256xf32> to vector<8x16xf32>
    %33 = vector.extract_strided_slice %30 {offsets = [0, 64], sizes = [8, 16], strides = [1, 1]} : vector<8x256xf32> to vector<8x16xf32>
    %34 = vector.extract_strided_slice %30 {offsets = [0, 96], sizes = [8, 16], strides = [1, 1]} : vector<8x256xf32> to vector<8x16xf32>
    %35 = vector.extract_strided_slice %30 {offsets = [0, 128], sizes = [8, 16], strides = [1, 1]} : vector<8x256xf32> to vector<8x16xf32>
    %36 = vector.extract_strided_slice %30 {offsets = [0, 160], sizes = [8, 16], strides = [1, 1]} : vector<8x256xf32> to vector<8x16xf32>
    %37 = vector.extract_strided_slice %30 {offsets = [0, 192], sizes = [8, 16], strides = [1, 1]} : vector<8x256xf32> to vector<8x16xf32>
    %38 = vector.extract_strided_slice %30 {offsets = [0, 224], sizes = [8, 16], strides = [1, 1]} : vector<8x256xf32> to vector<8x16xf32>
    %39 = tpu.concatenate %31, %32, %33, %34, %35, %36, %37, %38 in 1 : vector<8x16xf32>, vector<8x16xf32>, vector<8x16xf32>, vector<8x16xf32>, vector<8x16xf32>, vector<8x16xf32>, vector<8x16xf32>, vector<8x16xf32> -> vector<8x128xf32>
    %c0_30 = arith.constant 0 : index
    %c0_31 = arith.constant 0 : index
    %c0_32 = arith.constant 0 : index
    %40 = vector.load %arg5[%c0_30, %c0_31, %c0_32] : memref<1x8x128xf32, #tpu.memory_space<vmem>>, vector<1x8x128xf32>
    %41 = vector.shape_cast %40 : vector<1x8x128xf32> to vector<8x128xf32>
    %42 = vector.shape_cast %39 : vector<8x128xf32> to vector<1x8x128xf32>
    tpu.vector_store %arg5[%c0_30, %c0_31, %c0_32], %42 {strides = array<i32>} : memref<1x8x128xf32, #tpu.memory_space<vmem>>, vector<1x8x128xf32>,
    %cst_33 = arith.constant dense<0.000000e+00> : vector<8xf32>
    %43 = vector.multi_reduction <add>, %39, %cst_33 [1] : vector<8x128xf32> to vector<8xf32>
    %44 = vector.shape_cast %43 : vector<8xf32> to vector<8x1xf32>
    %45 = arith.mulf %39, %39 : vector<8x128xf32>
    %cst_34 = arith.constant dense<0.000000e+00> : vector<8xf32>
    %46 = vector.multi_reduction <add>, %45, %cst_34 [1] : vector<8x128xf32> to vector<8xf32>
    %47 = vector.shape_cast %46 : vector<8xf32> to vector<8x1xf32>
    %48 = tpu.concatenate %44, %47 in 1 : vector<8x1xf32>, vector<8x1xf32> -> vector<8x2xf32>
    %c0_35 = arith.constant 0 : index
    %c0_36 = arith.constant 0 : index
    %c0_37 = arith.constant 0 : index
    %c0_38 = arith.constant 0 : index
    %49 = vector.load %arg6[%c0_35, %c0_36, %c0_37, %c0_38] : memref<1x1x8x2xf32, #tpu.memory_space<vmem>>, vector<1x1x8x2xf32>
    %50 = vector.shape_cast %49 : vector<1x1x8x2xf32> to vector<8x2xf32>
    %51 = vector.shape_cast %48 : vector<8x2xf32> to vector<1x1x8x2xf32>
    tpu.vector_store %arg6[%c0_35, %c0_36, %c0_37, %c0_38], %51 {strides = array<i32>} : memref<1x1x8x2xf32, #tpu.memory_space<vmem>>, vector<1x1x8x2xf32>,
    return
  }
  func.func @transform_0(%arg0: i32, %arg1: i32) -> (i32, i32, i32) {
    %c0_i32 = arith.constant 0 : i32
    %c0_i32_0 = arith.constant 0 : i32
    return %arg0, %c0_i32, %arg1 : i32, i32, i32
  }
  func.func @transform_1(%arg0: i32, %arg1: i32) -> (i32, i32, i32) {
    %c1_i32 = arith.constant 1 : i32
    %0 = arith.addi %arg1, %c1_i32 : i32
    %c1_i32_0 = arith.constant 1 : i32
    %1 = arith.muli %0, %c1_i32_0 : i32
    %c0_i32 = arith.constant 0 : i32
    %c0_i32_1 = arith.constant 0 : i32
    return %arg0, %c0_i32, %1 : i32, i32, i32
  }
  func.func @transform_2(%arg0: i32, %arg1: i32) -> (i32, i32, i32) {
    %c0_i32 = arith.constant 0 : i32
    %c0_i32_0 = arith.constant 0 : i32
    %c0_i32_1 = arith.constant 0 : i32
    %c0_i32_2 = arith.constant 0 : i32
    return %c0_i32, %c0_i32_0, %c0_i32_1 : i32, i32, i32
  }
  func.func @transform_3(%arg0: i32, %arg1: i32) -> (i32, i32, i32) {
    %c0_i32 = arith.constant 0 : i32
    %c0_i32_0 = arith.constant 0 : i32
    return %arg0, %c0_i32, %arg1 : i32, i32, i32
  }
  func.func @transform_4(%arg0: i32, %arg1: i32) -> (i32, i32, i32, i32) {
    %c0_i32 = arith.constant 0 : i32
    %c0_i32_0 = arith.constant 0 : i32
    %c0_i32_1 = arith.constant 0 : i32
    return %arg0, %arg1, %c0_i32, %c0_i32_0 : i32, i32, i32, i32
  }
}

module attributes {stable_mosaic.version = 11 : i64} {
  func.func @_bn_relu_kernel(%arg0: i32, %arg1: i32, %arg2: memref<1x8x128xf32, #tpu.memory_space<vmem>>, %arg3: memref<8x1xf32, #tpu.memory_space<vmem>>, %arg4: memref<8x1xf32, #tpu.memory_space<vmem>>, %arg5: memref<1x8x128xf32, #tpu.memory_space<vmem>>) attributes {dimension_semantics = [#tpu.dimension_semantics<parallel>, #tpu.dimension_semantics<parallel>], iteration_bounds = array<i64: 2, 2>, scalar_prefetch = 0 : i64, scratch_operands = 0 : i64, tpu.core_type = #tpu.core_type<tc>, window_params = [{transform_indices = @transform_0, window_bounds = array<i64: 1, 8, 128>}, {pipeline_mode = #tpu.pipeline_mode<synchronous>, transform_indices = @transform_1, window_bounds = array<i64: 8, 1>}, {pipeline_mode = #tpu.pipeline_mode<synchronous>, transform_indices = @transform_2, window_bounds = array<i64: 8, 1>}, {transform_indices = @transform_3, window_bounds = array<i64: 1, 8, 128>}]} {
    %c0 = arith.constant 0 : index
    %c0_0 = arith.constant 0 : index
    %c0_1 = arith.constant 0 : index
    %0 = vector.load %arg2[%c0, %c0_0, %c0_1] : memref<1x8x128xf32, #tpu.memory_space<vmem>>, vector<1x8x128xf32>
    %1 = vector.shape_cast %0 : vector<1x8x128xf32> to vector<8x128xf32>
    %c0_2 = arith.constant 0 : index
    %c0_3 = arith.constant 0 : index
    %2 = vector.load %arg3[%c0_2, %c0_3] : memref<8x1xf32, #tpu.memory_space<vmem>>, vector<8x1xf32>
    %3 = vector.broadcast %2 : vector<8x1xf32> to vector<8x128xf32>
    %4 = arith.mulf %1, %3 : vector<8x128xf32>
    %c0_4 = arith.constant 0 : index
    %c0_5 = arith.constant 0 : index
    %5 = vector.load %arg4[%c0_4, %c0_5] : memref<8x1xf32, #tpu.memory_space<vmem>>, vector<8x1xf32>
    %6 = vector.broadcast %5 : vector<8x1xf32> to vector<8x128xf32>
    %7 = arith.addf %4, %6 : vector<8x128xf32>
    %cst = arith.constant 0.000000e+00 : f32
    %8 = vector.broadcast %cst : f32 to vector<8x128xf32>
    %9 = arith.maximumf %7, %8 : vector<8x128xf32>
    %c0_6 = arith.constant 0 : index
    %c0_7 = arith.constant 0 : index
    %c0_8 = arith.constant 0 : index
    %10 = vector.load %arg5[%c0_6, %c0_7, %c0_8] : memref<1x8x128xf32, #tpu.memory_space<vmem>>, vector<1x8x128xf32>
    %11 = vector.shape_cast %10 : vector<1x8x128xf32> to vector<8x128xf32>
    %12 = vector.shape_cast %9 : vector<8x128xf32> to vector<1x8x128xf32>
    tpu.vector_store %arg5[%c0_6, %c0_7, %c0_8], %12 {strides = array<i32>} : memref<1x8x128xf32, #tpu.memory_space<vmem>>, vector<1x8x128xf32>,
    return
  }
  func.func @transform_0(%arg0: i32, %arg1: i32) -> (i32, i32, i32) {
    %c0_i32 = arith.constant 0 : i32
    %c0_i32_0 = arith.constant 0 : i32
    return %arg0, %c0_i32, %arg1 : i32, i32, i32
  }
  func.func @transform_1(%arg0: i32, %arg1: i32) -> (i32, i32) {
    %c0_i32 = arith.constant 0 : i32
    %c0_i32_0 = arith.constant 0 : i32
    %c0_i32_1 = arith.constant 0 : i32
    return %c0_i32, %c0_i32_0 : i32, i32
  }
  func.func @transform_2(%arg0: i32, %arg1: i32) -> (i32, i32) {
    %c0_i32 = arith.constant 0 : i32
    %c0_i32_0 = arith.constant 0 : i32
    %c0_i32_1 = arith.constant 0 : i32
    return %c0_i32, %c0_i32_0 : i32, i32
  }
  func.func @transform_3(%arg0: i32, %arg1: i32) -> (i32, i32, i32) {
    %c0_i32 = arith.constant 0 : i32
    %c0_i32_0 = arith.constant 0 : i32
    return %arg0, %c0_i32, %arg1 : i32, i32, i32
  }
}

</mosaic_0001>

<bundles_post_ra>
// kernel: conv2d_bn_relu.3
= control target key start
LH: loop header
LB: loop body
LE: loop exit
PB: predicated region body
PF: predicated region fallthrough
CT: control target
= control target key end

     0   :  { %s419_s12 = smov 0   ;;  %s421_s13 = smov 0   ;;  %s476_s0 = inlined_call_operand.vmem [shape: f32[2,8,256], index: 0, kind: input, shape index: {}]   ;;  %s477_s1 = inlined_call_operand.vmem [shape: f32[8,1], index: 1, kind: input, shape index: {}]   ;;  %s478_s2 = inlined_call_operand.vmem [shape: f32[8,1], index: 2, kind: input, shape index: {}]   ;;  %s479_s3 = inlined_call_operand.vmem [shape: f32[2,8,256], index: 3, kind: output, shape index: {}]  }
   0x1   :  { %s423_s14 = smov 0   ;;  %s425_s15 = smov 0  }
   0x2   :  { %s427_s16 = smov 0  }
   0x3 LB: > { %s22_s17 = sadd.s32 1, %s388_s14  ;;  %s25_s18 = sadd.s32 1, %s392_s15  ;;  %s396_s16 = sphi %s427_s16, %s13_s16   ;;  %s392_s15 = sphi %s425_s15, %s483_s15   ;;  %s388_s14 = sphi %s423_s14, %s482_s14   ;;  %s384_s13 = sphi %s421_s13, %s481_s13   ;;  %s380_s12 = sphi %s419_s12, %s480_s12  }
   0x4   : > { %p23_p0 = scmp.ge.s32.totalorder %s22_s17, 2  ;;  %p309_p1 = scmp.ge.s32.totalorder %s396_s16, 1 }
   0x5   : > { %p156_p2 = scmp.lt.s32.totalorder %s396_s16, 5 }
   0x6   : > { %s485_s17 = smov (%p23_p0, %s22_s17), 0  ;;  %s487_s18 = smov (!%p23_p0, %s25_s18), %s392_s15 }
   0x7   : > { %p157_p3 = pnand %p309_p1, %p156_p2  ;;  %p27_p4 = scmp.ge.s32.totalorder %s487_s18, 2 }
   0x8   : > { %v203_v0 = vld [vmem:[%s477_s1] sm:$0xff] (!%p157_p3)  ;;  %v398_v1 = vmov (!%p157_p3), 0   ;;  %p186_p5 = scmp.lt.s32.totalorder (!%p157_p3), %s384_s13, 1  ;;  %p188_p6 = scmp.lt.s32.totalorder (!%p157_p3), %s380_s12, 1 }
   0x9   : > { %s489_s18 = smov (%p27_p4, %s487_s18), 0  ;;  %160 = sbr.rel (%p157_p3) target bundleno = 148 (0x94), region = 32 }
   0xa   : > { %357 = vset.pattern.permute.xlu0 (!%p157_p3), %v398_v1  ;;  %v210_v2 = vld [vmem:[%s478_s2] sm:$0xff] (!%p157_p3) }
   0xb   : > { %206 = vperm.xlu0 (!%p157_p3), %357, %v203_v0  }
   0xf   : > { %213 = vperm.xlu0 (!%p157_p3), %357, %v210_v2  }
  0x10   : > { %s491_s13 = smov (!%p186_p5, %s384_s13), 1  ;;  %s493_s12 = smov (!%p188_p6, %s380_s12), 1 }
  0x11   : > { %s310_s23 = sshll.u32 %s491_s13, 1 }
  0x12   : > { %s191_s24 = sadd.s32 %s310_s23, %s493_s12 }
  0x13   : > { %s311_s25 = sshll.u32 %s191_s24, 3 }
  0x14   : > { %s193_s28 = scalar_lea.vmem %s476_s0, %s311_s25  ;;  %s201_s4 = scalar_lea.vmem %s479_s3, %s311_s25 }
  0x15   : > { %v202_v4 = vld [vmem:[%s193_s28] sm:$0xff] }
  0x8a   : > { %v207_v3 = vpop.permute.xlu0 %206 }
  0x8b   : > { %v209_v5 = vmul.f32 %v207_v3, %v202_v4 }
  0x8e   : > { %v214_v6 = vpop.permute.xlu0 %213 }
  0x8f   : > { %v216_v7 = vadd.f32 %v214_v6, %v209_v5 }
  0x91   : > { %v217_v8 = vmax.f32 %v216_v7, 0.0 }
  0x93   : > { %218 = vst [vmem:[%s201_s4] sm:$0xff] %v217_v8 }
  0x94 PF: > { %s13_s16 = sadd.s32 1, %s396_s16   ;;  %s480_s12 = smov %s388_s14 }
  0x95   : > { %p10_p7 = scmp.ge.s32.totalorder %s13_s16, 6   ;;  %s481_s13 = smov %s392_s15 }
  0x96   : > { %s482_s14 = smov %s485_s17  ;;  %s483_s15 = smov %s489_s18 }
  0x97   :  { %12 = sbr.rel (!%p10_p7) target bundleno = 3 (0x3), region = 62 }

// kernel: conv2d_bn_relu.2
= control target key start
LH: loop header
LB: loop body
LE: loop exit
PB: predicated region body
PF: predicated region fallthrough
CT: control target
= control target key end

     0   :  { %s1089_s15 = smov 0   ;;  %s1091_s16 = smov 0   ;;  %s1228_s0 = inlined_call_operand.vmem [shape: f32[2,4,768], index: 0, kind: input, shape index: {}, may-alias: {0,1}]   ;;  %s1229_s1 = inlined_call_operand.vmem [shape: f32[2,4,768], index: 1, kind: input, shape index: {}, may-alias: {0,1}]   ;;  %s1230_s2 = inlined_call_operand.vmem [shape: f32[3,8,12], index: 2, kind: input, shape index: {}]   ;;  %s1231_s3 = inlined_call_operand.vmem [shape: f32[2,8,256], index: 3, kind: output, shape index: {0}]   ;;  %s1232_s4 = inlined_call_operand.vmem [shape: f32[2,2,8,2], index: 4, kind: output, shape index: {1}]  }
   0x1   :  { %s1093_s17 = smov 0   ;;  %s1095_s18 = smov 0  }
   0x2   :  { %s1097_s19 = smov 0  }
   0x3 LB: > { %s24_s20 = sadd.s32 1, %s1043_s17  ;;  %s27_s21 = sadd.s32 1, %s1047_s18  ;;  %s1051_s19 = sphi %s1097_s19, %s15_s19   ;;  %s1047_s18 = sphi %s1095_s18, %s1238_s18   ;;  %s1043_s17 = sphi %s1093_s17, %s1237_s17   ;;  %s1039_s16 = sphi %s1091_s16, %s1236_s16   ;;  %s1035_s15 = sphi %s1089_s15, %s1235_s15  }
   0x4   : > { %p25_p0 = scmp.ge.s32.totalorder %s24_s20, 2  ;;  %p851_p1 = scmp.ge.s32.totalorder %s1051_s19, 1 }
   0x5   : > { %p209_p2 = scmp.lt.s32.totalorder %s1051_s19, 5 }
   0x6   : > { %s1240_s20 = smov (%p25_p0, %s24_s20), 0  ;;  %s1242_s21 = smov (!%p25_p0, %s27_s21), %s1047_s18 }
   0x7   : > { %p210_p3 = pnand %p851_p1, %p209_p2  ;;  %p29_p4 = scmp.ge.s32.totalorder %s1242_s21, 2 }
   0x8   : > { %s852_s22 = sshll.u32 (!%p210_p3), %s1035_s15, 1  ;;  %p261_p5 = scmp.lt.s32.totalorder (!%p210_p3), %s1039_s16, 1  ;;  %vm327_vm0 = vcmask (!%p210_p3), 1031168   ;;  %vm316_vm1 = vcmask (!%p210_p3), 1039360   ;;  %vm330_vm2 = vcmask (!%p210_p3), 1043456   ;;  %vm1056_vm3 = vmmov (!%p210_p3), 1  }
   0x9   : > { %s1244_s21 = smov (%p29_p4, %s1242_s21), 0  ;;  %213 = sbr.rel (%p210_p3) target bundleno = 779 (0x30b), region = 32 }
   0xa   : > { %p263_p6 = scmp.lt.s32.totalorder (!%p210_p3), %s852_s22, 5  ;;  %s874_s23 = sadd.s32 (!%p210_p3), 2, %s852_s22  ;;  %vm1148_vm4 = vmpackc.low (!%p210_p3), %vm330_vm2, %vm1056_vm3  ;;  %v1057_v37 = vmov (!%p210_p3), 0.0   ;;  %v333_v49 = vld [vmem:[%s1230_s2] sm:$0xff] (!%p210_p3)  ;;  %vm360_vm5 = vcmask (!%p210_p3), 97280   ;;  %vm353_vm6 = vcmask (!%p210_p3), 785408  }
   0xb   : > { %p274_p7 = scmp.lt.s32.totalorder (!%p210_p3), %s874_s23, 5  ;;  %s1053_s9 = smov (!%p210_p3), 127   ;;  %510 = vmatprep.mubr.f32.mxu0 (!%p210_p3), %v1057_v37  ;;  %432 = vmatprep.mubr.f32.mxu1 (!%p210_p3), %v1057_v37  ;;  %vm564_vm7 = vcmask (!%p210_p3), 523264   ;;  %vm674_vm8 = vcmask (!%p210_p3), 130048   ;;  %vm676_vm9 = vcmask (!%p210_p3), 261120   ;;  %vm678_vm10 = vcmask (!%p210_p3), 392192  }
   0xc   : > { %s1054_s10 = smov (!%p210_p3), 126   ;;  %s1055_s11 = smov (!%p210_p3), 96   ;;  %vm681_vm11 = vcmask (!%p210_p3), 654336   ;;  %vm684_vm12 = vcmask (!%p210_p3), 916480   ;;  %vm692_vm13 = vcmask (!%p210_p3), 7168   ;;  %vm694_vm14 = vcmask (!%p210_p3), 15360  }
   0xd   : > { %s1058_s14 = smov (!%p210_p3), 64   ;;  %s1060_s27 = smov (!%p210_p3), 80  }
   0xe   : > { %s1061_s28 = smov (!%p210_p3), 48   ;;  %p284_p8 = scmp.lt.s32.totalorder (!%p210_p3), %s1035_s15, 1 }
  0x10   : > { %s1246_s16 = smov (!%p261_p5, %s1039_s16), 1  ;;  %s1248_s22 = smov (!%p263_p6, %s852_s22), 5 }
  0x11   : > { %s897_s24 = smul.u32 6, %s1246_s16  ;;  %s1250_s23 = smov (!%p274_p7, %s874_s23), 5 }
  0x12   : > { %s1252_s15 = smov (!%p284_p8, %s1035_s15), 1 }
  0x13   : > { %s266_s25 = sadd.s32 %s897_s24, %s1248_s22  ;;  %s277_s30 = sadd.s32 %s897_s24, %s1250_s23 }
  0x14   : > { %s853_s26 = sshll.u32 %s266_s25, 2  ;;  %s855_s5 = sshll.u32 %s277_s30, 2 }
  0x15   : > { %s268_s29 = scalar_lea.vmem %s1228_s0, %s853_s26  ;;  %s279_s8 = scalar_lea.vmem %s1229_s1, %s855_s5 }
  0x16   : > { %v1128_v0 = vld [vmem:[%s268_s29] sm:$0xff]  ;;  %s1059_s26 = smov 112   ;;  %s1062_s29 = smov 32  }
  0x17   : > { %v308_v1 = vcombine.low %v1128_v0, %v1128_v0  ;;  %v300_v3 = vld [vmem:[%s279_s8] sm:$0xff]  ;;  %v305_v4 = vcombine.high %v1128_v0, %v1128_v0  ;;  %v974_v11 = vpack.i.bf16 %v1128_v0, %v1128_v0  ;;  %s1063_s30 = smov 16   ;;  %s856_s5 = sshll.u32 %s1246_s16, 1 }
  0x18   : > { %301 = vst [vmem:[#allocation2 + $0x8] sm:$0xff] %v300_v3  ;;  %s287_s6 = sadd.s32 %s856_s5, %s1252_s15 }
  0x19   : > { %v959_v2 = vpack.i.bf16 %v308_v1, %v308_v1  ;;  %s857_s7 = sshll.u32 %s287_s6, 3 }
  0x1b   : > { %960 = vrot.lane.b32.xlu1 %v959_v2, %s1053_s9 }
  0x1f   : > { %v303_v5 = vld [vmem:[#allocation2 + $0x8] sm:$0xf] }
  0x20   : > { %v518_v6 = vld [vmem:[#allocation2 + $0x8] sm:$0xf]  ;;  %v309_v7 = vcombine.low %v303_v5, %v303_v5  ;;  %v964_v9 = vpack.i.bf16 %v303_v5, %v305_v4 }
  0x21   : > { %v524_v8 = vcombine.low %v518_v6, %v518_v6  ;;  %v969_v13 = vpack.i.bf16 %v518_v6, %v305_v4 }
  0x22   : > { %v949_v10 = vpack.i.bf16 %v309_v7, %v1128_v0  ;;  %965 = vrot.lane.b32.xlu1 %v964_v9, %s1054_s10 }
  0x23   : > { %v954_v12 = vpack.i.bf16 %v524_v8, %v1128_v0 }
  0x24   : > { %950 = vrot.lane.b32.xlu0 %v949_v10, %s1053_s9 }
  0x26   : > { %975 = vrot.lane.b32.xlu1 %v974_v11, %s1054_s10 }
  0x28   : > { %955 = vrot.lane.b32.xlu0 %v954_v12, %s1053_s9 }
  0x2c   : > { %970 = vrot.lane.b32.xlu0 %v969_v13, %s1054_s10  ;;  %s289_s10 = scalar_lea.vmem %s1231_s3, %s857_s7 }
  0x8d   : > { %v961_v14 = vpop.permute.xlu1 %960 }
  0x8e   : > { %v962_v16 = vunpack.i.l.bf16 %v961_v14  ;;  %v963_v48 = vunpack.i.h.bf16 %v961_v14 }
  0x94   : > { %v966_v15 = vpop.permute.xlu1 %965 }
  0x95   : > { %v968_v17 = vunpack.i.h.bf16 %v966_v15  ;;  %v967_v18 = vunpack.i.l.bf16 %v966_v15 }
  0x96   : > { %v951_v19 = vpop.permute.xlu0 %950 }
  0x97   : > { %v953_v20 = vunpack.i.h.bf16 %v951_v19  ;;  %v952_v21 = vunpack.i.l.bf16 %v951_v19  ;;  %v329_v22 = vsel %vm327_vm0, %v967_v18, %v968_v17 }
  0x98   : > { %v979_v23 = vpack.i.bf16 %v968_v17, %v329_v22  ;;  %v976_v24 = vpop.permute.xlu1 %975 }
  0x99   : > { %v318_v25 = vsel %vm316_vm1, %v952_v21, %v953_v20  ;;  %v317_v26 = vsel %vm316_vm1, %v962_v16, %v952_v21  ;;  %v335_v27 = vsel %vm330_vm2, %v303_v5, %v953_v20  ;;  %v977_v30 = vunpack.i.l.bf16 %v976_v24 }
  0x9a   : > { %v956_v28 = vpop.permute.xlu0 %955  ;;  %v332_v29 = vsel %vm330_vm2, %v305_v4, %v318_v25  ;;  %980 = vrot.lane.b32.xlu1 %v979_v23, %s1055_s11  ;;  %v331_v32 = vsel %vm330_vm2, %v1128_v0, %v317_v26  ;;  %v978_v46 = vunpack.i.h.bf16 %v976_v24  ;;  %v867_v24 = vld [vmem:[%s1230_s2 + $0x10] sm:$0xff] }
  0x9b   : > { %v958_v33 = vunpack.i.h.bf16 %v956_v28  ;;  %v957_v34 = vunpack.i.l.bf16 %v956_v28  ;;  %v989_v35 = vpack.i.bf16 %v335_v27, %v332_v29  ;;  %v881_v36 = vpack.c.bf16 %v329_v22, %v332_v29  ;;  %v860_v22 = vld [vmem:[%s1230_s2 + $0x8] sm:$0xff] }
  0x9c   : > { %v328_v38 = vsel %vm327_vm0, %v977_v30, %v967_v18 }
  0x9d   : > { %v532_v39 = vsel %vm316_vm1, %v957_v34, %v958_v33  ;;  %990 = vrot.lane.b32.xlu0 %v989_v35, %s1055_s11  ;;  %883 = vmatprep.subr.msk.bf16.mxu0 %vm1148_vm4, %v881_v36  ;;  %v546_v40 = vsel %vm330_vm2, %v518_v6, %v958_v33  ;;  %v884_v43 = vpack.c.bf16 %v328_v38, %v331_v32 }
  0x9e   : > { %v971_v41 = vpop.permute.xlu0 %970  ;;  %v545_v42 = vsel %vm330_vm2, %v305_v4, %v532_v39  ;;  %v531_v51 = vsel %vm316_vm1, %v963_v48, %v957_v34  ;;  %v999_v53 = vpack.i.bf16 %v328_v38, %v331_v32 }
  0x9f   : > { %v973_v44 = vunpack.i.h.bf16 %v971_v41  ;;  %v972_v45 = vunpack.i.l.bf16 %v971_v41  ;;  %v994_v47 = vpack.i.bf16 %v546_v40, %v545_v42  ;;  %886 = vmatpush1.bf16.msk.msra.mxu0 %vm1148_vm4, %v884_v43  ;;  %v544_v55 = vsel %vm330_vm2, %v1128_v0, %v531_v51 }
  0xa1   : > { %v543_v50 = vsel %vm327_vm0, %v972_v45, %v973_v44  ;;  %995 = vrot.lane.b32.xlu0 %v994_v47, %s1058_s14  ;;  %v542_v54 = vsel %vm327_vm0, %v978_v46, %v972_v45 }
  0xa2   : > { %v984_v52 = vpack.i.bf16 %v973_v44, %v543_v50  ;;  %866 = vmatmul.mubr.msk.f32.vlgmr.msra.gmra.mrb[0].mxu0 %vm360_vm5, %v333_v49  ;;  %v1004_v56 = vpack.i.bf16 %v542_v54, %v544_v55 }
  0xa3   : > { %642 = vmatprep.mubr.f32.mxu0 %v1057_v37 }
  0xa4   : > { %985 = vrot.lane.b32.xlu1 %v984_v52, %s1058_s14 }
  0xa5   : > { %1000 = vrot.lane.b32.xlu0 %v999_v53, %s1055_s11 }
  0xa8   : > { %1005 = vrot.lane.b32.xlu1 %v1004_v56, %s1058_s14 }
 0x10c   : > { %v981_v57 = vpop.permute.xlu1 %980 }
 0x10d   : > { %v983_v58 = vunpack.i.h.bf16 %v981_v57  ;;  %v982_v59 = vunpack.i.l.bf16 %v981_v57 }
 0x10f   : > { %v991_v60 = vpop.permute.xlu0 %990  ;;  %v357_v63 = vsel %vm353_vm6, %v982_v59, %v983_v58 }
 0x110   : > { %v993_v61 = vunpack.i.h.bf16 %v991_v60  ;;  %v992_v62 = vunpack.i.l.bf16 %v991_v60 }
 0x112   : > { %v355_v1 = vsel %vm353_vm6, %v992_v62, %v993_v61 }
 0x113   : > { %v996_v2 = vpop.permute.xlu0 %995  ;;  %v875_v3 = vpack.c.bf16 %v357_v63, %v355_v1 }
 0x114   : > { %v998_v4 = vunpack.i.h.bf16 %v996_v2  ;;  %v997_v5 = vunpack.i.l.bf16 %v996_v2 }
 0x115   : > { %877 = vmatprep.subr.msk.bf16.mxu1 %vm1148_vm4, %v875_v3 }
 0x116   : > { %v986_v0 = vpop.permute.xlu1 %985  ;;  %v566_v11 = vsel %vm564_vm7, %v997_v5, %v998_v4 }
 0x117   : > { %v988_v6 = vunpack.i.h.bf16 %v986_v0  ;;  %v987_v7 = vunpack.i.l.bf16 %v986_v0  ;;  %v1001_v8 = vpop.permute.xlu0 %1000 }
 0x118   : > { %v1003_v9 = vunpack.i.h.bf16 %v1001_v8  ;;  %v1002_v10 = vunpack.i.l.bf16 %v1001_v8 }
 0x119   : > { %v568_v12 = vsel %vm564_vm7, %v987_v7, %v988_v6 }
 0x11a   : > { %v887_v13 = vpack.c.bf16 %v568_v12, %v566_v11  ;;  %v1006_v14 = vpop.permute.xlu1 %1005  ;;  %v354_v15 = vsel %vm353_vm6, %v1002_v10, %v992_v62  ;;  %v356_v16 = vsel %vm353_vm6, %v1003_v9, %v982_v59 }
 0x11b   : > { %v1008_v17 = vunpack.i.h.bf16 %v1006_v14  ;;  %v1007_v18 = vunpack.i.l.bf16 %v1006_v14  ;;  %v878_v19 = vpack.c.bf16 %v356_v16, %v354_v15 }
 0x11c   : > { %889 = vmatprep.subr.msk.bf16.mxu0 %vm1148_vm4, %v887_v13 }
 0x11d   : > { %v565_v20 = vsel %vm564_vm7, %v1007_v18, %v997_v5  ;;  %v567_v21 = vsel %vm564_vm7, %v1008_v17, %v987_v7  ;;  %880 = vmatpush1.bf16.msk.msra.mxu1 %vm1148_vm4, %v878_v19 }
 0x11e   : > { %v890_v23 = vpack.c.bf16 %v567_v21, %v565_v20 }
 0x120   : > { %892 = vmatpush1.bf16.msk.msra.mxu0 %vm1148_vm4, %v890_v23  ;;  %863 = vmatmul.mubr.msk.f32.vlgmr.msra.gmra.mrb[0].mxu1 %vm360_vm5, %v860_v22 }
 0x123   : > { %870 = vmatmul.mubr.msk.f32.vlgmr.msra.gmra.mrb[0].mxu0 %vm360_vm5, %v867_v24 }
 0x1f3   : > { %v434_v25 = vpop.f32.mrb[0].mxu1 }
 0x1f4   : > { %v436_v26 = vpop.f32.mrb[1].mxu1 }
 0x1f6   : > { %v644_v27 = vpop.f32.mrb[0].mxu0 }
 0x1f7   : > { %v893_v28 = vadd.f32 %v644_v27, %v434_v25  ;;  %v646_v29 = vpop.f32.mrb[1].mxu0 }
 0x1f8   : > { %v894_v30 = vadd.f32 %v646_v29, %v436_v26 }
 0x1f9   : > { %655 = vrot.lane.b32.xlu1 %v893_v28, %s1055_s11  ;;  %652 = vrot.lane.b32.xlu0 %v893_v28, %s1059_s26  ;;  %s297_s11 = scalar_lea.vmem %s1232_s4, %s857_s7 }
 0x1fd   : > { %658 = vrot.lane.b32.xlu0 %v893_v28, %s1060_s27  ;;  %662 = vrot.lane.b32.xlu1 %v894_v30, %s1058_s14 }
 0x201   : > { %665 = vrot.lane.b32.xlu0 %v894_v30, %s1061_s28  ;;  %668 = vrot.lane.b32.xlu1 %v894_v30, %s1062_s29 }
 0x205   : > { %671 = vrot.lane.b32.xlu0 %v894_v30, %s1063_s30 }
 0x26b   : > { %v656_v31 = vpop.permute.xlu1 %655  ;;  %v653_v32 = vpop.permute.xlu0 %652 }
 0x26c   : > { %v675_v33 = vsel %vm674_vm8, %v893_v28, %v653_v32 }
 0x26d   : > { %v677_v34 = vsel %vm676_vm9, %v675_v33, %v656_v31 }
 0x26f   : > { %v659_v35 = vpop.permute.xlu0 %658  ;;  %v663_v36 = vpop.permute.xlu1 %662 }
 0x270   : > { %v679_v37 = vsel %vm678_vm10, %v677_v34, %v659_v35 }
 0x271   : > { %v680_v38 = vsel %vm564_vm7, %v679_v37, %v663_v36 }
 0x273   : > { %v666_v39 = vpop.permute.xlu0 %665  ;;  %v669_v41 = vpop.permute.xlu1 %668 }
 0x274   : > { %v682_v40 = vsel %vm681_vm11, %v680_v38, %v666_v39 }
 0x275   : > { %v683_v42 = vsel %vm353_vm6, %v682_v40, %v669_v41 }
 0x277   : > { %v672_v43 = vpop.permute.xlu0 %671 }
 0x278   : > { %v685_v44 = vsel %vm684_vm12, %v683_v42, %v672_v43 }
 0x279   : > { %687 = vadd.xlane.f32.xlu1 %v685_v44  ;;  %686 = vst [vmem:[%s289_s10] sm:$0xff] %v685_v44  ;;  %v689_v45 = vmul.f32 %v685_v44, %v685_v44 }
 0x27b   : > { %690 = vadd.xlane.f32.xlu0 %v689_v45 }
 0x306   : > { %v688_v46 = vpop.xlane.xlu1 %687 }
 0x308   : > { %v691_v47 = vpop.xlane.xlu0 %690 }
 0x309   : > { %v693_v48 = vsel %vm692_vm13, %v688_v46, %v691_v47 }
 0x30a   : > { %695 = vst.msk [vmem:[%s297_s11] sm:$0xff] %vm694_vm14, %v693_v48 }
 0x30b PF: > { %s15_s19 = sadd.s32 1, %s1051_s19   ;;  %s1235_s15 = smov %s1043_s17 }
 0x30c   : > { %p12_p9 = scmp.ge.s32.totalorder %s15_s19, 6   ;;  %s1236_s16 = smov %s1047_s18 }
 0x30d   : > { %s1237_s17 = smov %s1240_s20  ;;  %s1238_s18 = smov %s1244_s21 }
 0x30e   :  { %14 = sbr.rel (!%p12_p9) target bundleno = 3 (0x3), region = 79 }

</bundles_post_ra>
